<compile_context>
chip_gen: v6e
topology: v6e:2x2x1
jax: 0.10.0
libtpu: 0.0.40
codegen_flags: <defaults>
</compile_context>

<pallas_src>
import jax
import jax.numpy as jnp
from jax import lax
from jax.experimental import pallas as pl
from jax.experimental.pallas import tpu as pltpu

LN_EPS = 1e-5  # torch.nn.LayerNorm default


# ---------------------------------------------------------------------------
# Helpers
# ---------------------------------------------------------------------------
def _round_up(x: int, m: int) -> int:
    return (x + m - 1) // m * m


def _sublane_pack(itemsize: int) -> int:
    # rows per packed vreg sublane group: f32 -> 8, bf16 -> 16, int8/fp8 -> 32
    return max(1, 4 // max(1, itemsize)) * 8


def _vmem_cap_bytes() -> int:
    try:
        return int(pltpu.get_tpu_info().vmem_capacity_bytes)
    except Exception:
        return 64 * 1024 * 1024          # v7x floor -> safe on every generation


def _vmem_limit_bytes(*single_buffer_bytes: int) -> int:
    # double-buffered blocks + 50% headroom, clamped to ~80% of physical VMEM
    est = int(1.5 * sum(2 * b for b in single_buffer_bytes))
    cap = int(0.8 * _vmem_cap_bytes())
    return min(max(est, 16 * 1024 * 1024), cap)


def _choose_row_tile(n_rows: int, d: int, itemsize: int, min_tiles: int = 2) -> int:
    """Byte-sized row tile (~2 MiB x block), sublane-packed, >= min_tiles steps."""
    pack = _sublane_pack(itemsize)
    target_bytes = 2 << 20
    tr = max(pack, (target_bytes // max(1, d * itemsize)) // pack * pack)
    tr = min(tr, 1024)
    # v7x megacore: keep >= min_tiles row tiles so the parallel row axis can
    # shard across both TensorCores (negligible cost on 1-TC chips).
    if n_rows // min_tiles >= pack:
        tr = min(tr, (n_rows // min_tiles) // pack * pack)
    tr = min(tr, _round_up(n_rows, pack))
    return tr


def _choose_n_tile(d_out_pad: int, d_in: int, wsz: int) -> int:
    """Full-width (grid-invariant, VMEM-resident) weight block when it fits."""
    resident_budget = _vmem_cap_bytes() // 8   # ~16 MiB (128 MiB parts), ~8 MiB (v7x)
    if d_in * d_out_pad * wsz <= resident_budget:
        return d_out_pad
    for tn in (512, 256, 128):                 # lane-dense multiples of 128
        if d_out_pad % tn == 0:
            return tn
    return d_out_pad


# ---------------------------------------------------------------------------
# Pallas kernels
# ---------------------------------------------------------------------------
def _layernorm_rows(x_f32, g_f32, b_f32):
    """Two-pass LayerNorm over the last dim of an f32 row tile."""
    d = x_f32.shape[-1]
    mean = jnp.sum(x_f32, axis=-1, keepdims=True) * (1.0 / d)
    xc = x_f32 - mean
    var = jnp.sum(xc * xc, axis=-1, keepdims=True) * (1.0 / d)
    inv = lax.rsqrt(var + LN_EPS)               # EUP (free slot)
    return xc * inv * g_f32 + b_f32


def _layernorm_kernel(x_ref, g_ref, b_ref, o_ref):
    # x_ref: (TR, D) row tile; g_ref / b_ref: (1, D)
    y = _layernorm_rows(x_ref[...].astype(jnp.float32),
                        g_ref[...].astype(jnp.float32),
                        b_ref[...].astype(jnp.float32))
    o_ref[...] = y.astype(o_ref.dtype)


def _prenorm_linear_resident_kernel(x_ref, g_ref, bln_ref, wt_ref, bfc_ref, o_ref):
    # Single N tile: the whole weight is VMEM-resident (index_map never changes)
    # and the LayerNorm result flows straight from registers into the MXU.
    xn = _layernorm_rows(x_ref[...].astype(jnp.float32),
                         g_ref[...].astype(jnp.float32),
                         bln_ref[...].astype(jnp.float32)).astype(x_ref.dtype)
    acc = jnp.dot(xn, wt_ref[...], preferred_element_type=jnp.float32)
    o_ref[...] = (acc + bfc_ref[...].astype(jnp.float32)).astype(o_ref.dtype)


def _prenorm_linear_tiled_kernel(x_ref, g_ref, bln_ref, wt_ref, bfc_ref, o_ref,
                                 xn_ref):
    # grid = (row tiles, output-feature tiles); LN computed once per row tile
    # at j == 0 and cached in VMEM scratch, reused for every N tile.
    @pl.when(pl.program_id(1) == 0)
    def _():
        y = _layernorm_rows(x_ref[...].astype(jnp.float32),
                            g_ref[...].astype(jnp.float32),
                            bln_ref[...].astype(jnp.float32))
        xn_ref[...] = y.astype(xn_ref.dtype)

    acc = jnp.dot(xn_ref[...], wt_ref[...], preferred_element_type=jnp.float32)
    o_ref[...] = (acc + bfc_ref[...].astype(jnp.float32)).astype(o_ref.dtype)


# ---------------------------------------------------------------------------
# Wrappers
# ---------------------------------------------------------------------------
@jax.jit
def layernorm_pallas(x, gamma, beta):
    """LayerNorm over the last dim of x (any leading shape)."""
    orig_shape = x.shape
    D = orig_shape[-1]
    x2 = x.reshape(-1, D)
    R = x2.shape[0]
    isz = jnp.dtype(x.dtype).itemsize

    TR = _choose_row_tile(R, D, isz)
    out = pl.pallas_call(
        _layernorm_kernel,
        out_shape=jax.ShapeDtypeStruct((R, D), x.dtype),
        grid_spec=pltpu.PrefetchScalarGridSpec(
            num_scalar_prefetch=0,
            grid=(pl.cdiv(R, TR),),            # ragged last tile handled by Pallas
            in_specs=[
                pl.BlockSpec((TR, D), lambda i: (i, 0)),
                pl.BlockSpec((1, D), lambda i: (0, 0)),
                pl.BlockSpec((1, D), lambda i: (0, 0)),
            ],
            out_specs=pl.BlockSpec((TR, D), lambda i: (i, 0)),
        ),
        compiler_params=pltpu.CompilerParams(
            dimension_semantics=("parallel",),
            vmem_limit_bytes=_vmem_limit_bytes(
                TR * D * isz, TR * D * isz, 2 * D * isz),
        ),
    )(x2, gamma.reshape(1, D), beta.reshape(1, D))
    return out.reshape(orig_shape)


@jax.jit
def prenorm_linear_pallas(x, gamma, beta, wt, b):
    """Fused y = LayerNorm(x) @ wt + b, with wt already in (D_in, D_out) layout."""
    orig_shape = x.shape
    D_in = orig_shape[-1]
    D_out = wt.shape[1]
    x2 = x.reshape(-1, D_in)
    R = x2.shape[0]
    isz = jnp.dtype(x.dtype).itemsize
    wsz = jnp.dtype(wt.dtype).itemsize

    # Lane-dense output stores: pad D_out up to a multiple of 128 (zero columns
    # are sliced off after the kernel).  No-op when already aligned.
    D_out_pad = _round_up(D_out, 128)
    if D_out_pad != D_out:
        wt = jnp.pad(wt, ((0, 0), (0, D_out_pad - D_out)))
        b = jnp.pad(b, ((0, D_out_pad - D_out),))

    TR = _choose_row_tile(R, D_in, isz)
    TN = _choose_n_tile(D_out_pad, D_in, wsz)
    NI = pl.cdiv(R, TR)
    NJ = D_out_pad // TN

    vmem = _vmem_limit_bytes(
        TR * D_in * isz,          # x row tile
        2 * D_in * isz,           # gamma + beta
        D_in * TN * wsz,          # weight tile
        TN * isz,                 # linear bias tile
        TR * TN * isz,            # output tile
        TR * D_in * isz)          # xn scratch (tiled path only; conservative)

    # TODO(synk): optionally cast xn / wt to bf16 for native-rate MXU on v6e/v7x
    # when the precision budget allows; kept in the input dtype here.

    if NJ == 1:
        out = pl.pallas_call(
            _prenorm_linear_resident_kernel,
            out_shape=jax.ShapeDtypeStruct((R, D_out_pad), x.dtype),
            grid_spec=pltpu.PrefetchScalarGridSpec(
                num_scalar_prefetch=0,
                grid=(NI,),
                in_specs=[
                    pl.BlockSpec((TR, D_in), lambda i: (i, 0)),        # x rows
                    pl.BlockSpec((1, D_in), lambda i: (0, 0)),         # gamma
                    pl.BlockSpec((1, D_in), lambda i: (0, 0)),         # beta
                    pl.BlockSpec((D_in, D_out_pad), lambda i: (0, 0)),  # weight (fetched once)
                    pl.BlockSpec((1, D_out_pad), lambda i: (0, 0)),    # linear bias
                ],
                out_specs=pl.BlockSpec((TR, D_out_pad), lambda i: (i, 0)),
            ),
            compiler_params=pltpu.CompilerParams(
                dimension_semantics=("parallel",),
                vmem_limit_bytes=vmem,
            ),
        )(x2, gamma.reshape(1, D_in), beta.reshape(1, D_in), wt,
          b.reshape(1, D_out_pad))
    else:
        out = pl.pallas_call(
            _prenorm_linear_tiled_kernel,
            out_shape=jax.ShapeDtypeStruct((R, D_out_pad), x.dtype),
            grid_spec=pltpu.PrefetchScalarGridSpec(
                num_scalar_prefetch=0,
                grid=(NI, NJ),
                in_specs=[
                    pl.BlockSpec((TR, D_in), lambda i, j: (i, 0)),
                    pl.BlockSpec((1, D_in), lambda i, j: (0, 0)),
                    pl.BlockSpec((1, D_in), lambda i, j: (0, 0)),
                    pl.BlockSpec((D_in, TN), lambda i, j: (0, j)),
                    pl.BlockSpec((1, TN), lambda i, j: (0, j)),
                ],
                out_specs=pl.BlockSpec((TR, TN), lambda i, j: (i, j)),
                scratch_shapes=[pltpu.VMEM((TR, D_in), x.dtype)],
            ),
            compiler_params=pltpu.CompilerParams(
                dimension_semantics=("parallel", "arbitrary"),
                vmem_limit_bytes=vmem,
            ),
        )(x2, gamma.reshape(1, D_in), beta.reshape(1, D_in), wt,
          b.reshape(1, D_out_pad))

    if D_out_pad != D_out:
        out = out[:, :D_out]
    return out.reshape(orig_shape[:-1] + (D_out,))


class PreNormPallas:
    """PreNorm(dim, fn): y = fn(LayerNorm(dim)(x), **kwargs).

    If `fn` is a Linear (weights supplied), LayerNorm + Linear are fused into a
    single Pallas kernel; otherwise the standalone LayerNorm kernel runs and
    `fn` is applied to its output as plain JAX.
    """

    def __init__(self, dim, gamma, beta, fn=None, linear_w=None, linear_b=None):
        self.dim = dim
        self.gamma = gamma
        self.beta = beta
        self.fn = fn
        # Hoisted one-time layout fix: torch Linear weight (D_out, D_in) ->
        # (D_in, D_out).  Avoids a per-forward HBM read+write of the weight.
        self.linear_wt = None if linear_w is None else jnp.transpose(linear_w)
        self.linear_b = linear_b

    def __call__(self, x, **kwargs):
        if self.linear_wt is not None:
            return prenorm_linear_pallas(
                x, self.gamma, self.beta, self.linear_wt, self.linear_b)
        # TODO(synk): arbitrary wrapped fn (e.g. deformable attention) stays plain JAX.
        return self.fn(layernorm_pallas(x, self.gamma, self.beta), **kwargs)


# ---------------------------------------------------------------------------
# Pure-JAX references for verification
# ---------------------------------------------------------------------------
def _layernorm_ref(x, gamma, beta):
    xf = x.astype(jnp.float32)
    mean = jnp.mean(xf, axis=-1, keepdims=True)
    var = jnp.mean((xf - mean) ** 2, axis=-1, keepdims=True)
    return ((xf - mean) / jnp.sqrt(var + LN_EPS)) * gamma + beta


def _prenorm_linear_ref(x, gamma, beta, w, b):
    y = _layernorm_ref(x, gamma, beta)
    return y @ w.T.astype(jnp.float32) + b.astype(jnp.float32)


if __name__ == "__main__":
    # Small shapes consistent with the module: (B, N, D) tokens, lane-dense D.
    # N = 100 deliberately exercises the ragged (cdiv) row-tile path.
    B, N, D = 2, 100, 128
    key = jax.random.PRNGKey(0)
    kx, kg, kb, kw, kbf, kw2, kb2 = jax.random.split(key, 7)

    x = jax.random.normal(kx, (B, N, D), dtype=jnp.float32)

    # LayerNorm params (non-trivial affine to exercise gamma/beta)
    gamma = 1.0 + 0.1 * jax.random.normal(kg, (D,), dtype=jnp.float32)
    beta = 0.05 * jax.random.normal(kb, (D,), dtype=jnp.float32)

    # fn = Linear(D, D): fused path, aligned D_out
    w = 0.05 * jax.random.normal(kw, (D, D), dtype=jnp.float32)
    b = 0.01 * jax.random.normal(kbf, (D,), dtype=jnp.float32)
    prenorm = PreNormPallas(D, gamma, beta, linear_w=w, linear_b=b)
    out = jax.block_until_ready(prenorm(x))
    ref = _prenorm_linear_ref(x, gamma, beta, w, b)
    assert out.shape == (B, N, D)
    assert jnp.allclose(out, ref, atol=1e-4, rtol=1e-4), "fused prenorm+linear mismatch"

    # fn = Linear(D, 96): exercises the unaligned-D_out (128-pad + slice) path
    w2 = 0.05 * jax.random.normal(kw2, (96, D), dtype=jnp.float32)
    b2 = 0.01 * jax.random.normal(kb2, (96,), dtype=jnp.float32)
    prenorm2 = PreNormPallas(D, gamma, beta, linear_w=w2, linear_b=b2)
    out2 = jax.block_until_ready(prenorm2(x))
    ref2 = _prenorm_linear_ref(x, gamma, beta, w2, b2)
    assert out2.shape == (B, N, 96)
    assert jnp.allclose(out2, ref2, atol=1e-4, rtol=1e-4), "padded D_out mismatch"

    # Standalone LayerNorm kernel (generic-fn path)
    ln = jax.block_until_ready(layernorm_pallas(x, gamma, beta))
    ln_ref = _layernorm_ref(x, gamma, beta)
    assert jnp.allclose(ln, ln_ref, atol=1e-4, rtol=1e-4), "layernorm mismatch"

    print("KERNEL_OK")
</pallas_src>

<mosaic_0001>
module attributes {stable_mosaic.version = 11 : i64} {
  func.func @_prenorm_linear_resident_kernel(%arg0: i32, %arg1: memref<96x128xf32, #tpu.memory_space<vmem>>, %arg2: memref<1x128xf32, #tpu.memory_space<vmem>>, %arg3: memref<1x128xf32, #tpu.memory_space<vmem>>, %arg4: memref<128x128xf32, #tpu.memory_space<vmem>>, %arg5: memref<1x128xf32, #tpu.memory_space<vmem>>, %arg6: memref<96x128xf32, #tpu.memory_space<vmem>>) attributes {dimension_semantics = [#tpu.dimension_semantics<parallel>], iteration_bounds = array<i64: 3>, scalar_prefetch = 0 : i64, scratch_operands = 0 : i64, tpu.core_type = #tpu.core_type<tc>, window_params = [{transform_indices = @transform_0, window_bounds = array<i64: 96, 128>}, {pipeline_mode = #tpu.pipeline_mode<synchronous>, transform_indices = @transform_1, window_bounds = array<i64: 1, 128>}, {pipeline_mode = #tpu.pipeline_mode<synchronous>, transform_indices = @transform_2, window_bounds = array<i64: 1, 128>}, {pipeline_mode = #tpu.pipeline_mode<synchronous>, transform_indices = @transform_3, window_bounds = array<i64: 128, 128>}, {pipeline_mode = #tpu.pipeline_mode<synchronous>, transform_indices = @transform_4, window_bounds = array<i64: 1, 128>}, {transform_indices = @transform_5, window_bounds = array<i64: 96, 128>}]} {
    %c0 = arith.constant 0 : index
    %c0_0 = arith.constant 0 : index
    %0 = vector.load %arg1[%c0, %c0_0] : memref<96x128xf32, #tpu.memory_space<vmem>>, vector<96x128xf32>
    %c0_1 = arith.constant 0 : index
    %c0_2 = arith.constant 0 : index
    %1 = vector.load %arg2[%c0_1, %c0_2] : memref<1x128xf32, #tpu.memory_space<vmem>>, vector<1x128xf32>
    %c0_3 = arith.constant 0 : index
    %c0_4 = arith.constant 0 : index
    %2 = vector.load %arg3[%c0_3, %c0_4] : memref<1x128xf32, #tpu.memory_space<vmem>>, vector<1x128xf32>
    %cst = arith.constant dense<0.000000e+00> : vector<96xf32>
    %3 = vector.multi_reduction <add>, %0, %cst [1] : vector<96x128xf32> to vector<96xf32>
    %4 = vector.shape_cast %3 : vector<96xf32> to vector<96x1xf32>
    %cst_5 = arith.constant 7.812500e-03 : f32
    %5 = vector.broadcast %cst_5 : f32 to vector<96x1xf32>
    %6 = arith.mulf %4, %5 : vector<96x1xf32>
    %7 = vector.broadcast %6 : vector<96x1xf32> to vector<96x128xf32>
    %8 = arith.subf %0, %7 : vector<96x128xf32>
    %9 = arith.mulf %8, %8 : vector<96x128xf32>
    %cst_6 = arith.constant dense<0.000000e+00> : vector<96xf32>
    %10 = vector.multi_reduction <add>, %9, %cst_6 [1] : vector<96x128xf32> to vector<96xf32>
    %11 = vector.shape_cast %10 : vector<96xf32> to vector<96x1xf32>
    %cst_7 = arith.constant 7.812500e-03 : f32
    %12 = vector.broadcast %cst_7 : f32 to vector<96x1xf32>
    %13 = arith.mulf %11, %12 : vector<96x1xf32>
    %cst_8 = arith.constant 9.99999974E-6 : f32
    %14 = vector.broadcast %cst_8 : f32 to vector<96x1xf32>
    %15 = arith.addf %13, %14 : vector<96x1xf32>
    %16 = math.rsqrt %15 : vector<96x1xf32>
    %17 = vector.broadcast %16 : vector<96x1xf32> to vector<96x128xf32>
    %18 = arith.mulf %8, %17 : vector<96x128xf32>
    %19 = vector.broadcast %1 : vector<1x128xf32> to vector<96x128xf32>
    %20 = arith.mulf %18, %19 : vector<96x128xf32>
    %21 = vector.broadcast %2 : vector<1x128xf32> to vector<96x128xf32>
    %22 = arith.addf %20, %21 : vector<96x128xf32>
    %c0_9 = arith.constant 0 : index
    %c0_10 = arith.constant 0 : index
    %23 = vector.load %arg4[%c0_9, %c0_10] : memref<128x128xf32, #tpu.memory_space<vmem>>, vector<128x128xf32>
    %cst_11 = arith.constant dense<0.000000e+00> : vector<96x128xf32>
    %24 = tpu.matmul %22, %23, %cst_11 {dimension_numbers = #tpu.dot_dimension_numbers<[1], [0], [0], [1], [0, 0, 1, 1], [], []>} : vector<96x128xf32>, vector<128x128xf32>, vector<96x128xf32> -> vector<96x128xf32>
    %c0_12 = arith.constant 0 : index
    %c0_13 = arith.constant 0 : index
    %25 = vector.load %arg5[%c0_12, %c0_13] : memref<1x128xf32, #tpu.memory_space<vmem>>, vector<1x128xf32>
    %26 = vector.broadcast %25 : vector<1x128xf32> to vector<96x128xf32>
    %27 = arith.addf %24, %26 : vector<96x128xf32>
    %c0_14 = arith.constant 0 : index
    %c0_15 = arith.constant 0 : index
    %28 = vector.load %arg6[%c0_14, %c0_15] : memref<96x128xf32, #tpu.memory_space<vmem>>, vector<96x128xf32>
    tpu.vector_store %arg6[%c0_14, %c0_15], %27 {strides = array<i32>} : memref<96x128xf32, #tpu.memory_space<vmem>>, vector<96x128xf32>,
    return
  }
  func.func @transform_0(%arg0: i32) -> (i32, i32) {
    %c0_i32 = arith.constant 0 : i32
    %c0_i32_0 = arith.constant 0 : i32
    return %arg0, %c0_i32 : i32, i32
  }
  func.func @transform_1(%arg0: i32) -> (i32, i32) {
    %c0_i32 = arith.constant 0 : i32
    %c0_i32_0 = arith.constant 0 : i32
    %c0_i32_1 = arith.constant 0 : i32
    return %c0_i32, %c0_i32_0 : i32, i32
  }
  func.func @transform_2(%arg0: i32) -> (i32, i32) {
    %c0_i32 = arith.constant 0 : i32
    %c0_i32_0 = arith.constant 0 : i32
    %c0_i32_1 = arith.constant 0 : i32
    return %c0_i32, %c0_i32_0 : i32, i32
  }
  func.func @transform_3(%arg0: i32) -> (i32, i32) {
    %c0_i32 = arith.constant 0 : i32
    %c0_i32_0 = arith.constant 0 : i32
    %c0_i32_1 = arith.constant 0 : i32
    return %c0_i32, %c0_i32_0 : i32, i32
  }
  func.func @transform_4(%arg0: i32) -> (i32, i32) {
    %c0_i32 = arith.constant 0 : i32
    %c0_i32_0 = arith.constant 0 : i32
    %c0_i32_1 = arith.constant 0 : i32
    return %c0_i32, %c0_i32_0 : i32, i32
  }
  func.func @transform_5(%arg0: i32) -> (i32, i32) {
    %c0_i32 = arith.constant 0 : i32
    %c0_i32_0 = arith.constant 0 : i32
    return %arg0, %c0_i32 : i32, i32
  }
}

</mosaic_0001>

<bundles_post_ra>
// kernel: prenorm_linear_pallas.1
= control target key start
LH: loop header
LB: loop body
LE: loop exit
PB: predicated region body
PF: predicated region fallthrough
CT: control target
= control target key end

     0   :  { %s1217_s18 = smov 0   ;;  %s1219_s19 = smov 0   ;;  %s1489_s0 = inlined_call_operand.vmem [shape: f32[200,128], index: 0, kind: input, shape index: {}]   ;;  %s1490_s1 = inlined_call_operand.vmem [shape: f32[1,128], index: 1, kind: input, shape index: {}]   ;;  %s1491_s2 = inlined_call_operand.vmem [shape: f32[1,128], index: 2, kind: input, shape index: {}]   ;;  %s1492_s3 = inlined_call_operand.vmem [shape: f32[128,128], index: 3, kind: input, shape index: {}]   ;;  %s1493_s4 = inlined_call_operand.vmem [shape: f32[1,128], index: 4, kind: input, shape index: {}]   ;;  %s1494_s5 = inlined_call_operand.vmem [shape: f32[200,128], index: 5, kind: output, shape index: {}]  }
   0x1   :  { %s1221_s20 = smov 0  }
   0x2 LB: > { %s1230_s21 = sadd.s32 4294967295, %s1153_s20   ;;  %s1232_s22 = sadd.s32 1, %s1153_s20   ;;  %s1153_s20 = sphi %s1221_s20, %s1501_s20   ;;  %s1149_s19 = sphi %s1219_s19, %s1500_s19   ;;  %s1145_s18 = sphi %s1217_s18, %s1499_s18  }
   0x3   : > { %s129_s23 = ssub.s32 %s1153_s20, %s1232_s22  ;;  %s132_s24 = sadd.s32 1, %s1149_s19 }
   0x4   : > { %p130_p0 = scmp.eq.s32.totalorder %s129_s23, 0  ;;  %p142_p1 = scmp.ne.s32.totalorder %s1149_s19, %s1145_s18 }
   0x5   : > { %p143_p2 = scmp.eq.s32.totalorder %s1230_s21, 2  ;;  %p853_p3 = scmp.ge.s32.totalorder %s1153_s20, 1 }
   0x6   : > { %s1240_s25 = scalar_select %p130_p0, %s1149_s19, %s132_s24  }
   0x7   : > { %p1242_p4 = por %p143_p2, %p142_p1  ;;  %p196_p5 = scmp.lt.s32.totalorder %s1153_s20, 4 }
   0x9   : > { %p197_p6 = pnand %p853_p3, %p196_p5 }
   0xa   : > { %s1247_s27 = smul.u32 (!%p197_p6), 12, %s1230_s21  ;;  %s224_s8 = sand.u32 (!%p197_p6), 1, %s1145_s18  }
   0xb   : > { %200 = sbr.rel (%p197_p6) target bundleno = 602 (0x25a), region = 40 }
   0xc   : > { %p232_p7 = scmp.lt.s32.totalorder (!%p197_p6), %s1247_s27, 24  ;;  %s981_s9 = smul.u32 (!%p197_p6), 96, %s224_s8 }
   0xe   : > { %s1416_s12 = scalar_lea.vmem (!%p197_p6), [#allocation2], %s981_s9  }
  0x10   : > { %s233_s28 = scalar_select %p232_p7, %s1247_s27, 24  ;;  %v443_v12 = vld [vmem:[%s1492_s3 + $0x78] sm:$0xff]  ;;  %v442_v13 = vld [vmem:[%s1492_s3 + $0x70] sm:$0xff]  ;;  %v441_v46 = vld [vmem:[%s1492_s3 + $0x68] sm:$0xff] }
  0x11   : > { %899 = vmatprep.subr.mxu0 %v443_v12  ;;  %949 = vmatprep.subr.mxu1 %v443_v12  ;;  %v440_v50 = vld [vmem:[%s1492_s3 + $0x60] sm:$0xff]  ;;  %v439_v59 = vld [vmem:[%s1492_s3 + $0x58] sm:$0xff]  ;;  %v438_v63 = vld [vmem:[%s1492_s3 + $0x50] sm:$0xff]  ;;  %s596_s18 = ssub.s32 (%p1242_p4), 25, %s1247_s27  ;;  %s870_s13 = smul.u32 (%p1242_p4), 96, %s1230_s21 }
  0x12   : > { %s854_s29 = sshll.u32 %s233_s28, 3  ;;  %900 = vmatpush3.msra.mxu0 %v443_v12  ;;  %965 = vmatpush3.msra.mxu1 %v443_v12  ;;  %p597_p8 = scmp.lt.s32.totalorder (%p1242_p4), %s596_s18, 12 }
  0x13   : > { %s235_s7 = scalar_lea.vmem %s1489_s0, %s854_s29  ;;  %901 = vmatprep.subr.mxu0 %v442_v13  ;;  %950 = vmatprep.subr.mxu1 %v442_v13  ;;  %s1437_s16 = scalar_lea.vmem (%p1242_p4), %s1494_s5, %s870_s13  }
  0x14   : > { %v246_v0 = vld [vmem:[%s235_s7] sm:$0xff]  ;;  %v247_v1 = vld [vmem:[%s235_s7 + $0x8] sm:$0xff]  ;;  %v252_v2 = vld [vmem:[%s235_s7 + $0x30] sm:$0xff]  ;;  %902 = vmatpush3.msra.mxu0 %v442_v13  ;;  %966 = vmatpush3.msra.mxu1 %v442_v13 }
  0x15   : > { %260 = vadd.xlane.f32.xlu0 %v246_v0  ;;  %262 = vadd.xlane.f32.xlu1 %v247_v1  ;;  %v253_v3 = vld [vmem:[%s235_s7 + $0x38] sm:$0xff]  ;;  %v248_v4 = vld [vmem:[%s235_s7 + $0x10] sm:$0xff]  ;;  %v254_v5 = vld [vmem:[%s235_s7 + $0x40] sm:$0xff] }
  0x16   : > { %v249_v6 = vld [vmem:[%s235_s7 + $0x18] sm:$0xff]  ;;  %v255_v7 = vld [vmem:[%s235_s7 + $0x48] sm:$0xff]  ;;  %v1254_v8 = vld [vmem:[%s235_s7 + $0x20] sm:$0xff]  ;;  %903 = vmatprep.subr.mxu0 %v441_v46  ;;  %951 = vmatprep.subr.mxu1 %v441_v46 }
  0x17   : > { %v1256_v9 = vld [vmem:[%s235_s7 + $0x50] sm:$0xff]  ;;  %v1260_v10 = vld [vmem:[%s235_s7 + $0x28] sm:$0xff]  ;;  %v1262_v11 = vld [vmem:[%s235_s7 + $0x58] sm:$0xff]  ;;  %904 = vmatpush3.msra.mxu0 %v441_v46  ;;  %967 = vmatpush3.msra.mxu1 %v441_v46 }
  0x18   : > { %905 = vmatprep.subr.mxu0 %v440_v50  ;;  %952 = vmatprep.subr.mxu1 %v440_v50  ;;  %v1369_v46 = vld [vmem:[%s1490_s1] ss:$0 sm:$0xff] }
  0x19   : > { %272 = vadd.xlane.f32.xlu0 %v252_v2  ;;  %274 = vadd.xlane.f32.xlu1 %v253_v3 }
  0x1a   : > { %906 = vmatpush3.msra.mxu0 %v440_v50  ;;  %968 = vmatpush3.msra.mxu1 %v440_v50 }
  0x1b   : > { %907 = vmatprep.subr.mxu0 %v439_v59  ;;  %953 = vmatprep.subr.mxu1 %v439_v59 }
  0x1c   : > { %908 = vmatpush3.msra.mxu0 %v439_v59  ;;  %969 = vmatpush3.msra.mxu1 %v439_v59 }
  0x1d   : > { %264 = vadd.xlane.f32.xlu0 %v248_v4  ;;  %276 = vadd.xlane.f32.xlu1 %v254_v5 }
  0x1e   : > { %909 = vmatprep.subr.mxu0 %v438_v63  ;;  %954 = vmatprep.subr.mxu1 %v438_v63 }
  0x1f   : > { %910 = vmatpush3.msra.mxu0 %v438_v63  ;;  %970 = vmatpush3.msra.mxu1 %v438_v63 }
  0x21   : > { %266 = vadd.xlane.f32.xlu0 %v249_v6  ;;  %278 = vadd.xlane.f32.xlu1 %v255_v7 }
  0x25   : > { %268 = vadd.xlane.f32.xlu0 %v1254_v8  ;;  %280 = vadd.xlane.f32.xlu1 %v1256_v9 }
  0x29   : > { %270 = vadd.xlane.f32.xlu0 %v1260_v10  ;;  %282 = vadd.xlane.f32.xlu1 %v1262_v11 }
  0x9e   : > { %v261_v14 = vpop.xlane.xlu0 %260  ;;  %v263_v15 = vpop.xlane.xlu1 %262 }
  0x9f   : > { %v284_v16 = vmul.f32 0.0078125, %v261_v14  ;;  %v285_v17 = vmul.f32 0.0078125, %v263_v15 }
  0xa1   : > { %v1272_v18 = vsub.f32 %v246_v0, %v284_v16  ;;  %v1274_v19 = vsub.f32 %v247_v1, %v285_v17  ;;  %v437_v1 = vld [vmem:[%s1492_s3 + $0x48] sm:$0xff] }
  0xa2   : > { %v273_v20 = vpop.xlane.xlu0 %272  ;;  %v275_v21 = vpop.xlane.xlu1 %274  ;;  %911 = vmatprep.subr.mxu0 %v437_v1  ;;  %955 = vmatprep.subr.mxu1 %v437_v1 }
  0xa3   : > { %v290_v22 = vmul.f32 0.0078125, %v273_v20  ;;  %v308_v23 = vmul.f32 %v1272_v18, %v1272_v18  ;;  %v291_v24 = vmul.f32 0.0078125, %v275_v21  ;;  %v309_v27 = vmul.f32 %v1274_v19, %v1274_v19  ;;  %912 = vmatpush3.msra.mxu0 %v437_v1  ;;  %971 = vmatpush3.msra.mxu1 %v437_v1 }
  0xa5   : > { %v1278_v25 = vsub.f32 %v252_v2, %v290_v22  ;;  %320 = vadd.xlane.f32.xlu0 %v308_v23  ;;  %v1280_v26 = vsub.f32 %v253_v3, %v291_v24  ;;  %v436_v3 = vld [vmem:[%s1492_s3 + $0x40] sm:$0xff] }
  0xa6   : > { %v265_v28 = vpop.xlane.xlu0 %264  ;;  %v277_v29 = vpop.xlane.xlu1 %276  ;;  %913 = vmatprep.subr.mxu0 %v436_v3  ;;  %956 = vmatprep.subr.mxu1 %v436_v3 }
  0xa7   : > { %v286_v30 = vmul.f32 0.0078125, %v265_v28  ;;  %v314_v31 = vmul.f32 %v1278_v25, %v1278_v25  ;;  %v292_v32 = vmul.f32 0.0078125, %v277_v29  ;;  %v315_v35 = vmul.f32 %v1280_v26, %v1280_v26  ;;  %914 = vmatpush3.msra.mxu0 %v436_v3  ;;  %972 = vmatpush3.msra.mxu1 %v436_v3 }
  0xa9   : > { %v1286_v33 = vsub.f32 %v248_v4, %v286_v30  ;;  %322 = vadd.xlane.f32.xlu0 %v309_v27  ;;  %332 = vadd.xlane.f32.xlu1 %v314_v31  ;;  %v1288_v34 = vsub.f32 %v254_v5, %v292_v32  ;;  %v435_v4 = vld [vmem:[%s1492_s3 + $0x38] sm:$0xff]  ;;  %v434_v5 = vld [vmem:[%s1492_s3 + $0x30] sm:$0xff] }
  0xaa   : > { %v267_v36 = vpop.xlane.xlu0 %266  ;;  %v279_v37 = vpop.xlane.xlu1 %278  ;;  %915 = vmatprep.subr.mxu0 %v435_v4  ;;  %957 = vmatprep.subr.mxu1 %v435_v4 }
  0xab   : > { %v287_v38 = vmul.f32 0.0078125, %v267_v36  ;;  %v310_v39 = vmul.f32 %v1286_v33, %v1286_v33  ;;  %v293_v40 = vmul.f32 0.0078125, %v279_v37  ;;  %v316_v43 = vmul.f32 %v1288_v34, %v1288_v34  ;;  %916 = vmatpush3.msra.mxu0 %v435_v4  ;;  %973 = vmatpush3.msra.mxu1 %v435_v4 }
  0xac   : > { %917 = vmatprep.subr.mxu0 %v434_v5  ;;  %958 = vmatprep.subr.mxu1 %v434_v5 }
  0xad   : > { %v1294_v41 = vsub.f32 %v249_v6, %v287_v38  ;;  %334 = vadd.xlane.f32.xlu1 %v315_v35  ;;  %324 = vadd.xlane.f32.xlu0 %v310_v39  ;;  %v1296_v42 = vsub.f32 %v255_v7, %v293_v40  ;;  %v433_v6 = vld [vmem:[%s1492_s3 + $0x28] sm:$0xff]  ;;  %v432_v7 = vld [vmem:[%s1492_s3 + $0x20] sm:$0xff] }
  0xae   : > { %v269_v44 = vpop.xlane.xlu0 %268  ;;  %v281_v45 = vpop.xlane.xlu1 %280  ;;  %918 = vmatpush3.msra.mxu0 %v434_v5  ;;  %974 = vmatpush3.msra.mxu1 %v434_v5 }
  0xaf   : > { %v288_v47 = vmul.f32 0.0078125, %v269_v44  ;;  %v311_v48 = vmul.f32 %v1294_v41, %v1294_v41  ;;  %v294_v49 = vmul.f32 0.0078125, %v281_v45  ;;  %v317_v53 = vmul.f32 %v1296_v42, %v1296_v42  ;;  %919 = vmatprep.subr.mxu0 %v433_v6  ;;  %959 = vmatprep.subr.mxu1 %v433_v6 }
  0xb0   : > { %920 = vmatpush3.msra.mxu0 %v433_v6  ;;  %975 = vmatpush3.msra.mxu1 %v433_v6 }
  0xb1   : > { %v1309_v51 = vsub.f32 %v1254_v8, %v288_v47  ;;  %336 = vadd.xlane.f32.xlu1 %v316_v43  ;;  %326 = vadd.xlane.f32.xlu0 %v311_v48  ;;  %v1312_v52 = vsub.f32 %v1256_v9, %v294_v49  ;;  %v431_v8 = vld [vmem:[%s1492_s3 + $0x18] sm:$0xff]  ;;  %v430_v9 = vld [vmem:[%s1492_s3 + $0x10] sm:$0xff] }
  0xb2   : > { %v271_v54 = vpop.xlane.xlu0 %270  ;;  %v283_v55 = vpop.xlane.xlu1 %282  ;;  %921 = vmatprep.subr.mxu0 %v432_v7  ;;  %960 = vmatprep.subr.mxu1 %v432_v7 }
  0xb3   : > { %v289_v56 = vmul.f32 0.0078125, %v271_v54  ;;  %v312_v57 = vmul.f32 %v1309_v51, %v1309_v51  ;;  %v295_v58 = vmul.f32 0.0078125, %v283_v55  ;;  %v318_v62 = vmul.f32 %v1312_v52, %v1312_v52  ;;  %922 = vmatpush3.msra.mxu0 %v432_v7  ;;  %976 = vmatpush3.msra.mxu1 %v432_v7  ;;  %v1375_v54 = vld [vmem:[%s1491_s2] ss:$0 sm:$0xff] }
  0xb4   : > { %923 = vmatprep.subr.mxu0 %v431_v8  ;;  %961 = vmatprep.subr.mxu1 %v431_v8 }
  0xb5   : > { %v1322_v60 = vsub.f32 %v1260_v10, %v289_v56  ;;  %338 = vadd.xlane.f32.xlu1 %v317_v53  ;;  %328 = vadd.xlane.f32.xlu0 %v312_v57  ;;  %v1325_v61 = vsub.f32 %v1262_v11, %v295_v58  ;;  %v429_v10 = vld [vmem:[%s1492_s3 + $0x8] sm:$0xff]  ;;  %v428_v11 = vld [vmem:[%s1492_s3] sm:$0xff] }
  0xb6   : > { %924 = vmatpush3.msra.mxu0 %v431_v8  ;;  %977 = vmatpush3.msra.mxu1 %v431_v8 }
  0xb7   : > { %v313_v0 = vmul.f32 %v1322_v60, %v1322_v60  ;;  %v319_v2 = vmul.f32 %v1325_v61, %v1325_v61  ;;  %925 = vmatprep.subr.mxu0 %v430_v9  ;;  %962 = vmatprep.subr.mxu1 %v430_v9 }
  0xb8   : > { %926 = vmatpush3.msra.mxu0 %v430_v9  ;;  %978 = vmatpush3.msra.mxu1 %v430_v9 }
  0xb9   : > { %340 = vadd.xlane.f32.xlu1 %v318_v62  ;;  %330 = vadd.xlane.f32.xlu0 %v313_v0 }
  0xba   : > { %927 = vmatprep.subr.mxu0 %v429_v10  ;;  %963 = vmatprep.subr.mxu1 %v429_v10 }
  0xbb   : > { %928 = vmatpush3.msra.mxu0 %v429_v10  ;;  %979 = vmatpush3.msra.mxu1 %v429_v10 }
  0xbc   : > { %929 = vmatprep.subr.mxu0 %v428_v11  ;;  %964 = vmatprep.subr.mxu1 %v428_v11 }
  0xbd   : > { %342 = vadd.xlane.f32.xlu1 %v319_v2  ;;  %930 = vmatpush3.msra.mxu0 %v428_v11 }
  0xbe   : > { %980 = vmatpush3.msra.mxu1 %v428_v11 }
 0x12e   : > { %v321_v12 = vpop.xlane.xlu0 %320 }
 0x12f   : > { %v344_v13 = vmul.f32 0.0078125, %v321_v12 }
 0x131   : > { %v356_v14 = vadd.f32 1e-05, %v344_v13 }
 0x132   : > { %v333_v15 = vpop.xlane.xlu1 %332  ;;  %v323_v16 = vpop.xlane.xlu0 %322 }
 0x133   : > { %1071 = vrsqrt.f32 %v356_v14  ;;  %v350_v17 = vmul.f32 0.0078125, %v333_v15  ;;  %v345_v20 = vmul.f32 0.0078125, %v323_v16 }
 0x135   : > { %v362_v21 = vadd.f32 1e-05, %v350_v17  ;;  %v357_v22 = vadd.f32 1e-05, %v345_v20 }
 0x136   : > { %v335_v23 = vpop.xlane.xlu1 %334  ;;  %v325_v24 = vpop.xlane.xlu0 %324 }
 0x137   : > { %1073 = vrsqrt.f32 %v362_v21  ;;  %v351_v27 = vmul.f32 0.0078125, %v335_v23  ;;  %v346_v28 = vmul.f32 0.0078125, %v325_v24 }
 0x138   : > { %1075 = vrsqrt.f32 %v357_v22 }
 0x139   : > { %v363_v29 = vadd.f32 1e-05, %v351_v27  ;;  %v358_v30 = vadd.f32 1e-05, %v346_v28 }
 0x13a   : > { %v337_v31 = vpop.xlane.xlu1 %336  ;;  %v327_v32 = vpop.xlane.xlu0 %326 }
 0x13b   : > { %1077 = vrsqrt.f32 %v363_v29  ;;  %v352_v35 = vmul.f32 0.0078125, %v337_v31  ;;  %v347_v36 = vmul.f32 0.0078125, %v327_v32 }
 0x13c   : > { %1079 = vrsqrt.f32 %v358_v30 }
 0x13d   : > { %v364_v37 = vadd.f32 1e-05, %v352_v35  ;;  %v359_v38 = vadd.f32 1e-05, %v347_v36 }
 0x13e   : > { %v339_v39 = vpop.xlane.xlu1 %338  ;;  %v329_v40 = vpop.xlane.xlu0 %328 }
 0x13f   : > { %1081 = vrsqrt.f32 %v364_v37  ;;  %v353_v43 = vmul.f32 0.0078125, %v339_v39  ;;  %v348_v44 = vmul.f32 0.0078125, %v329_v40 }
 0x140   : > { %v1072_v45 = vpop.eup %1071  ;;  %1083 = vrsqrt.f32 %v359_v38 }
 0x141   : > { %v365_v47 = vadd.f32 1e-05, %v353_v43  ;;  %v360_v48 = vadd.f32 1e-05, %v348_v44  ;;  %v380_v49 = vmul.f32 %v1072_v45, %v1272_v18 }
 0x142   : > { %v341_v50 = vpop.xlane.xlu1 %340  ;;  %v331_v53 = vpop.xlane.xlu0 %330 }
 0x143   : > { %1085 = vrsqrt.f32 %v365_v47  ;;  %v354_v55 = vmul.f32 0.0078125, %v341_v50  ;;  %v349_v56 = vmul.f32 0.0078125, %v331_v53  ;;  %v398_v57 = vmul.f32 %v1369_v46, %v380_v49 }
 0x144   : > { %v1074_v58 = vpop.eup %1073  ;;  %1087 = vrsqrt.f32 %v360_v48 }
 0x145   : > { %v1076_v59 = vpop.eup %1075  ;;  %v366_v62 = vadd.f32 1e-05, %v354_v55  ;;  %v361_v63 = vadd.f32 1e-05, %v349_v56  ;;  %v416_v0 = vadd.f32 %v1375_v54, %v398_v57  ;;  %v386_v18 = vmul.f32 %v1074_v58, %v1278_v25 }
 0x146   : > { %v343_v1 = vpop.xlane.xlu1 %342  ;;  %v381_v2 = vmul.f32 %v1076_v59, %v1274_v19 }
 0x147   : > { %1089 = vrsqrt.f32 %v366_v62  ;;  %v355_v3 = vmul.f32 0.0078125, %v343_v1  ;;  %931 = vmatprep.mubr.f32.mxu0 %v416_v0  ;;  %v404_v4 = vmul.f32 %v1369_v46, %v386_v18 }
 0x148   : > { %v1078_v5 = vpop.eup %1077  ;;  %1091 = vrsqrt.f32 %v361_v63  ;;  %v399_v6 = vmul.f32 %v1369_v46, %v381_v2 }
 0x149   : > { %v1080_v7 = vpop.eup %1079  ;;  %v367_v8 = vadd.f32 1e-05, %v355_v3  ;;  %v422_v9 = vadd.f32 %v1375_v54, %v404_v4  ;;  %v387_v10 = vmul.f32 %v1078_v5, %v1280_v26 }
 0x14a   : > { %v417_v25 = vadd.f32 %v1375_v54, %v399_v6  ;;  %v382_v11 = vmul.f32 %v1080_v7, %v1286_v33 }
 0x14b   : > { %1093 = vrsqrt.f32 %v367_v8  ;;  %940 = vmatprep.mubr.f32.mxu1 %v422_v9  ;;  %v405_v19 = vmul.f32 %v1369_v46, %v387_v10 }
 0x14c   : > { %v1082_v12 = vpop.eup %1081  ;;  %932 = vmatmul.mubr.f32.vlgmr.msra.gmra.mxu0 %v417_v25  ;;  %v400_v13 = vmul.f32 %v1369_v46, %v382_v11 }
 0x14d   : > { %v1084_v14 = vpop.eup %1083  ;;  %v423_v15 = vadd.f32 %v1375_v54, %v405_v19  ;;  %v388_v16 = vmul.f32 %v1082_v12, %v1288_v34 }
 0x14e   : > { %v418_v17 = vadd.f32 %v1375_v54, %v400_v13  ;;  %v383_v26 = vmul.f32 %v1084_v14, %v1294_v41 }
 0x14f   : > { %941 = vmatmul.mubr.f32.vlgmr.msra.gmra.mxu1 %v423_v15  ;;  %v406_v33 = vmul.f32 %v1369_v46, %v388_v16 }
 0x150   : > { %v1086_v20 = vpop.eup %1085  ;;  %934 = vmatprep.mubr.f32.mxu0 %v418_v17  ;;  %v401_v21 = vmul.f32 %v1369_v46, %v383_v26 }
 0x151   : > { %v1088_v22 = vpop.eup %1087  ;;  %v424_v23 = vadd.f32 %v1375_v54, %v406_v33  ;;  %v389_v24 = vmul.f32 %v1086_v20, %v1296_v42 }
 0x152   : > { %v419_v27 = vadd.f32 %v1375_v54, %v401_v21  ;;  %v384_v34 = vmul.f32 %v1088_v22, %v1309_v51 }
 0x153   : > { %943 = vmatprep.mubr.f32.mxu1 %v424_v23  ;;  %v407_v28 = vmul.f32 %v1369_v46, %v389_v24 }
 0x154   : > { %v1090_v41 = vpop.eup %1089  ;;  %935 = vmatmul.mubr.f32.gmra.mxu0 %v419_v27  ;;  %v402_v29 = vmul.f32 %v1369_v46, %v384_v34 }
 0x155   : > { %v1092_v30 = vpop.eup %1091  ;;  %v425_v31 = vadd.f32 %v1375_v54, %v407_v28  ;;  %v390_v32 = vmul.f32 %v1090_v41, %v1312_v52 }
 0x156   : > { %v420_v35 = vadd.f32 %v1375_v54, %v402_v29  ;;  %v385_v42 = vmul.f32 %v1092_v30, %v1322_v60  ;;  %v857_v60 = vld [vmem:[%s1493_s4] ss:$0 sm:$0xff] }
 0x157   : > { %944 = vmatmul.mubr.f32.gmra.mxu1 %v425_v31  ;;  %v408_v51 = vmul.f32 %v1369_v46, %v390_v32 }
 0x158   : > { %v1094_v36 = vpop.eup %1093  ;;  %937 = vmatprep.mubr.f32.mxu0 %v420_v35  ;;  %v403_v37 = vmul.f32 %v1369_v46, %v385_v42 }
 0x159   : > { %v426_v38 = vadd.f32 %v1375_v54, %v408_v51  ;;  %v391_v39 = vmul.f32 %v1094_v36, %v1325_v61 }
 0x15a   : > { %v421_v40 = vadd.f32 %v1375_v54, %v403_v37 }
 0x15b   : > { %946 = vmatprep.mubr.f32.mxu1 %v426_v38  ;;  %v409_v52 = vmul.f32 %v1369_v46, %v391_v39 }
 0x15c   : > { %938 = vmatmul.mubr.f32.gmra.mxu0 %v421_v40 }
 0x15d   : > { %v427_v43 = vadd.f32 %v1375_v54, %v409_v52 }
 0x15f   : > { %947 = vmatmul.mubr.f32.gmra.mxu1 %v427_v43 }
 0x20c   : > { %v933_v44 = vpop.f32.mrf.mxu0 }
 0x20d   : > { %v523_v45 = vadd.f32 %v933_v44, %v857_v60 }
 0x20e   : > { %v517_v47 = vpop.f32.mrf.mxu0 }
 0x20f   : > { %577 = vst [vmem:[%s1416_s12 + $0x8] sm:$0xff] %v523_v45  ;;  %v518_v61 = vadd.f32 %v857_v60, %v517_v47  ;;  %v942_v46 = vpop.f32.mrf.mxu1 }
 0x210   : > { %v553_v48 = vadd.f32 %v942_v46, %v857_v60 }
 0x211   : > { %576 = vst [vmem:[%s1416_s12] sm:$0xff] %v518_v61  ;;  %v547_v49 = vpop.f32.mrf.mxu1 }
 0x212   : > { %583 = vst [vmem:[%s1416_s12 + $0x38] sm:$0xff] %v553_v48  ;;  %v548_v50 = vadd.f32 %v857_v60, %v547_v49 }
 0x214   : > { %582 = vst [vmem:[%s1416_s12 + $0x30] sm:$0xff] %v548_v50  ;;  %v936_v53 = vpop.f32.mrf.mxu0 }
 0x215   : > { %v533_v54 = vadd.f32 %v936_v53, %v857_v60 }
 0x216   : > { %v527_v55 = vpop.f32.mrf.mxu0 }
 0x217   : > { %579 = vst [vmem:[%s1416_s12 + $0x18] sm:$0xff] %v533_v54  ;;  %v528_v56 = vadd.f32 %v857_v60, %v527_v55  ;;  %v945_v57 = vpop.f32.mrf.mxu1 }
 0x218   : > { %v563_v58 = vadd.f32 %v945_v57, %v857_v60 }
 0x219   : > { %578 = vst [vmem:[%s1416_s12 + $0x10] sm:$0xff] %v528_v56  ;;  %v557_v59 = vpop.f32.mrf.mxu1 }
 0x21a   : > { %585 = vst [vmem:[%s1416_s12 + $0x48] sm:$0xff] %v563_v58  ;;  %v558_v62 = vadd.f32 %v857_v60, %v557_v59 }
 0x21c   : > { %584 = vst [vmem:[%s1416_s12 + $0x40] sm:$0xff] %v558_v62  ;;  %v939_v63 = vpop.f32.mrf.mxu0 }
 0x21d   : > { %v543_v0 = vadd.f32 %v939_v63, %v857_v60 }
 0x21e   : > { %v537_v18 = vpop.f32.mrf.mxu0 }
 0x21f   : > { %581 = vst [vmem:[%s1416_s12 + $0x28] sm:$0xff] %v543_v0  ;;  %v538_v1 = vadd.f32 %v857_v60, %v537_v18  ;;  %v948_v2 = vpop.f32.mrf.mxu1 }
 0x220   : > { %v573_v3 = vadd.f32 %v948_v2, %v857_v60  ;;  %594 = sbr.rel (!%p1242_p4) target bundleno = 602 (0x25a), region = 44 }
 0x221   : > { %580 = vst [vmem:[%s1416_s12 + $0x20] sm:$0xff] %v538_v1  ;;  %v567_v4 = vpop.f32.mrf.mxu1 }
 0x222   : > { %587 = vst [vmem:[%s1416_s12 + $0x58] sm:$0xff] %v573_v3  ;;  %v568_v5 = vadd.f32 %v857_v60, %v567_v4 }
 0x224   : > { %586 = vst [vmem:[%s1416_s12 + $0x50] sm:$0xff] %v568_v5 }
 0x225   : > { %s1503_s18 = smov (!%p597_p8, %s596_s18), 12 }
 0x226   : > { %s858_s17 = sshll.u32 %s1503_s18, 7 }
 0x227   : > { %p861_p9 = scmp.eq.s32.totalorder %s858_s17, 0 }
 0x228   : > { %1095 = sdivrem.u32 (!%p861_p9), %s1503_s18, 12 }
 0x229   : > { %605 = sbr.rel (%p861_p9) target bundleno = 602 (0x25a), region = 48 }
 0x231   : > { %s1443_s26 = spop.drf %1095 }
 0x232   : > { %p862_p10 = scmp.le.s32.totalorder %s1443_s26, 0 }
 0x233   : > { %s1496_s21 = smov (!%p862_p10), %s1437_s16  ;;  %s1497_s27 = smov (!%p862_p10), %s1416_s12 }
 0x234   : > { %806 = sbr.rel (%p862_p10) target bundleno = 577 (0x241), region = 124  ;;  %s1452_s20 = smov (!%p862_p10), 0  }
 0x235   : > { %s1454_s23 = smov (!%p862_p10), 0  }
 0x239 LB: >> { %v692_v6 = vld [vmem:[%s1161_s27] sm:$0xff]  ;;  %v694_v7 = vld [vmem:[%s1161_s27 + $0x8] sm:$0xff]  ;;  %v696_v8 = vld [vmem:[%s1161_s27 + $0x10] sm:$0xff]  ;;  %s716_s24 = sadd.s32 1, %s1165_s20  ;;  %s686_s23 = sadd.s32 1, %s1169_s23   ;;  %s1169_s23 = sphi %s1454_s23, %s686_s23   ;;  %s1165_s20 = sphi %s1452_s20, %s1498_s20   ;;  %s1161_s27 = sphi %s1497_s27, %s721_s27   ;;  %s1157_s21 = sphi %s1496_s21, %s722_s21  }
 0x23a   : >> { %693 = vst [vmem:[%s1157_s21] sm:$0xff] %v692_v6  ;;  %695 = vst [vmem:[%s1157_s21 + $0x8] sm:$0xff] %v694_v7  ;;  %v698_v9 = vld [vmem:[%s1161_s27 + $0x18] sm:$0xff]  ;;  %v700_v10 = vld [vmem:[%s1161_s27 + $0x20] sm:$0xff]  ;;  %p717_p11 = scmp.ge.s32.totalorder %s716_s24, %s1443_s26  ;;  %p685_p12 = scmp.ge.s32.totalorder %s686_s23, %s1443_s26 }
 0x23b   : >> { %697 = vst [vmem:[%s1157_s21 + $0x10] sm:$0xff] %v696_v8  ;;  %v702_v25 = vld [vmem:[%s1161_s27 + $0x28] sm:$0xff]  ;;  %699 = vst [vmem:[%s1157_s21 + $0x18] sm:$0xff] %v698_v9  ;;  %v704_v11 = vld [vmem:[%s1161_s27 + $0x30] sm:$0xff] }
 0x23c   : >> { %701 = vst [vmem:[%s1157_s21 + $0x20] sm:$0xff] %v700_v10  ;;  %703 = vst [vmem:[%s1157_s21 + $0x28] sm:$0xff] %v702_v25  ;;  %v706_v19 = vld [vmem:[%s1161_s27 + $0x38] sm:$0xff]  ;;  %v708_v12 = vld [vmem:[%s1161_s27 + $0x40] sm:$0xff]  ;;  %s1505_s24 = smov (%p717_p11, %s716_s24), 0  ;;  %688 = sbr.rel (!%p685_p12) target bundleno = 569 (0x239), region = 130 }
 0x23d   : >> { %705 = vst [vmem:[%s1157_s21 + $0x30] sm:$0xff] %v704_v11  ;;  %707 = vst [vmem:[%s1157_s21 + $0x38] sm:$0xff] %v706_v19  ;;  %v710_v13 = vld [vmem:[%s1161_s27 + $0x48] sm:$0xff]  ;;  %v712_v14 = vld [vmem:[%s1161_s27 + $0x50] sm:$0xff]  ;;  %s719_s28 = smul.u32 96, %s1505_s24  ;;  %s1498_s20 = smov %s1505_s24 }
 0x23e   : >> { %709 = vst [vmem:[%s1157_s21 + $0x40] sm:$0xff] %v708_v12  ;;  %v714_v15 = vld [vmem:[%s1161_s27 + $0x58] sm:$0xff]  ;;  %711 = vst [vmem:[%s1157_s21 + $0x48] sm:$0xff] %v710_v13 }
 0x23f   : >> { %713 = vst [vmem:[%s1157_s21 + $0x50] sm:$0xff] %v712_v14  ;;  %715 = vst [vmem:[%s1157_s21 + $0x58] sm:$0xff] %v714_v15  ;;  %s721_s27 = scalar_lea.vmem %s1416_s12, %s719_s28 [#allocation2]   ;;  %s722_s21 = scalar_lea.vmem %s1437_s16, %s719_s28  }
 0x241 PF: > { %1097 = sdivrem.u32 %s1503_s18, 12 }
 0x242   : > { %s863_s29 = smul.u32 96, %s1443_s26 }
 0x244   : > { %s727_s30 = scalar_lea.vmem %s1416_s12, %s863_s29 [#allocation2]   ;;  %s729_s6 = scalar_lea.vmem %s1437_s16, %s863_s29  }
 0x24a   : > { %s1098_s7 = spop.drf %1097 }
 0x24b   : > { %p865_p13 = scmp.le.s32.totalorder %s1098_s7, 0 }
 0x24c   : > { %s1171_s8 = smov (!%p865_p13), %s729_s6   ;;  %s1175_s9 = smov (!%p865_p13), %s727_s30  }
 0x24d   : > { %820 = sbr.rel (%p865_p13) target bundleno = 602 (0x25a), region = 135  ;;  %s1179_s10 = smov (!%p865_p13), 0  }
 0x24e   : > { %s1183_s11 = smov (!%p865_p13), 0  }
 0x252 LB: >> { %v739_v16 = vld [vmem:[%s1177_s9] sm:$0xff]  ;;  %s741_s13 = sadd.s32 1, %s1181_s10  ;;  %s733_s11 = sadd.s32 1, %s1185_s11   ;;  %s1185_s11 = sphi %s1183_s11, %s733_s11   ;;  %s1181_s10 = sphi %s1179_s10, %s1180_s10   ;;  %s1177_s9 = sphi %s1175_s9, %s746_s9   ;;  %s1173_s8 = sphi %s1171_s8, %s747_s8  }
 0x253   : >> { %740 = vst [vmem:[%s1173_s8] sm:$0xff] %v739_v16  ;;  %p742_p0 = scmp.ge.s32.totalorder %s741_s13, %s1098_s7  ;;  %p732_p1 = scmp.ge.s32.totalorder %s733_s11, %s1098_s7 }
 0x255   : >> { %s1507_s13 = smov (%p742_p0, %s741_s13), 0  ;;  %735 = sbr.rel (!%p732_p1) target bundleno = 594 (0x252), region = 141 }
 0x256   : >> { %s866_s12 = sshll.u32 %s1507_s13, 3  ;;  %s1180_s10 = smov %s1507_s13  }
 0x257   : >> { %s746_s9 = scalar_lea.vmem %s727_s30, %s866_s12 [#allocation2]   ;;  %s747_s8 = scalar_lea.vmem %s729_s6, %s866_s12  }
 0x25a PF: > { %p12_p2 = scmp.ge.s32.totalorder %s1232_s22, 5   ;;  %s1499_s18 = smov %s1149_s19 }
 0x25b   : > { %s1500_s19 = smov %s1240_s25  ;;  %s1501_s20 = smov %s1232_s22 }
 0x25c   :  { %14 = sbr.rel (!%p12_p2) target bundleno = 2 (0x2), region = 152 }

</bundles_post_ra>
